<compile_context>
chip_gen: v6e
topology: v6e:2x2x1
jax: 0.10.0
libtpu: 0.0.40
codegen_flags: <defaults>
</compile_context>

<pallas_src>
import jax
import jax.numpy as jnp
from jax.experimental import pallas as pl
from jax.experimental.pallas import tpu as pltpu

IN_DIM = 28 * 28
OUT_DIM = 10
OUT_PAD = 128          # lane-dense padded logits width
NEG_BIG = -1e30        # "-inf" bias for padded logit columns (finite, f32 only)


def _round_up(n, m):
    return (n + m - 1) // m * m


def _cdiv(a, b):
    return -(-a // b)


def mlp_kernel(x_ref, w1_ref, b1_ref, w2_ref, b2_ref, w3_ref, b3_ref,
               w4_ref, b4_ref, o_ref):
    # x arrives already in bf16 (cast once in the wrapper).  MXU matmuls run
    # bf16 with f32 accumulation; bias/ReLU/softmax math stays in f32.
    x = x_ref[...]

    h1 = jnp.dot(x, w1_ref[...], preferred_element_type=jnp.float32) + b1_ref[...]
    h1 = jnp.maximum(h1, 0.0).astype(jnp.bfloat16)

    h2 = jnp.dot(h1, w2_ref[...], preferred_element_type=jnp.float32) + b2_ref[...]
    h2 = jnp.maximum(h2, 0.0).astype(jnp.bfloat16)

    h3 = jnp.dot(h2, w3_ref[...], preferred_element_type=jnp.float32) + b3_ref[...]
    h3 = jnp.maximum(h3, 0.0).astype(jnp.bfloat16)

    # 128-lane padded logits in f32: padded columns have zero weights and
    # ~-inf bias, so exp() flushes them to exactly 0 in the softmax.
    logits = jnp.dot(h3, w4_ref[...], preferred_element_type=jnp.float32) + b4_ref[...]

    m = jnp.max(logits, axis=-1, keepdims=True)
    e = jnp.exp(logits - m)
    denom = jnp.sum(e, axis=-1, keepdims=True)
    # bf16 store halves write-back bytes; probabilities survive bf16 easily.
    o_ref[...] = (e * pl.reciprocal(denom, approx=True)).astype(o_ref.dtype)


def prepare_params(params):
    """Cast weights to bf16 once and pad fc4 to a full 128-lane output tile.

    Input params: list of (w, b) with w shaped (in, out) = torch_W.T, b shaped (1, out).
    """
    (w1, b1), (w2, b2), (w3, b3), (w4, b4) = params
    w4p = jnp.zeros((w4.shape[0], OUT_PAD), jnp.float32).at[:, :OUT_DIM].set(w4)
    b4p = jnp.full((1, OUT_PAD), NEG_BIG, jnp.float32).at[:, :OUT_DIM].set(b4)
    bf16 = lambda w: w.astype(jnp.bfloat16)
    return (
        bf16(w1), b1.astype(jnp.float32),
        bf16(w2), b2.astype(jnp.float32),
        bf16(w3), b3.astype(jnp.float32),
        bf16(w4p), b4p,   # bias stays f32 (-1e30 is not representable in bf16)
    )


def _choose_batch_tile(B, max_tile=1024):
    """Padding-aware batch tile.

    Smallest tile count that respects `max_tile`, forced to an even count >= 2
    when B is big enough so dimension_semantics=("parallel",) actually splits
    tiles across both TensorCores on v7x.  Tile is a multiple of 8 sublanes.
    """
    n_tiles = _cdiv(B, max_tile)
    if B >= 16:
        n_tiles = max(n_tiles, 2)
    if n_tiles > 1 and (n_tiles % 2):
        n_tiles += 1
    return _round_up(_cdiv(B, n_tiles), 8)


def _mlp_forward_impl(x_nchw, kernel_params):
    """x_nchw: (B, 1, 28, 28) float. Returns (B, 10) softmax probabilities (f32)."""
    B = x_nchw.shape[0]
    # bf16 cast in the wrapper: halves the dominant input HBM stream.  Under
    # jit the reshape / cast / pad fuse into one preprocessing op.
    x2d = x_nchw.reshape(B, IN_DIM).astype(jnp.bfloat16)

    TB = _choose_batch_tile(B)
    B_pad = _round_up(B, TB)
    if B_pad != B:
        x2d = jnp.pad(x2d, ((0, B_pad - B), (0, 0)))

    w1, b1, w2, b2, w3, b3, w4p, b4p = kernel_params

    # Weights / biases: same block for every grid step -> stay VMEM resident.
    pinned = lambda shape: pl.BlockSpec(shape, lambda i: (0, 0))

    out = pl.pallas_call(
        mlp_kernel,
        out_shape=jax.ShapeDtypeStruct((B_pad, OUT_PAD), jnp.bfloat16),
        grid_spec=pltpu.PrefetchScalarGridSpec(
            num_scalar_prefetch=0,
            grid=(B_pad // TB,),
            in_specs=[
                pl.BlockSpec((TB, IN_DIM), lambda i: (i, 0)),
                pinned(w1.shape), pinned(b1.shape),
                pinned(w2.shape), pinned(b2.shape),
                pinned(w3.shape), pinned(b3.shape),
                pinned(w4p.shape), pinned(b4p.shape),
            ],
            out_specs=pl.BlockSpec((TB, OUT_PAD), lambda i: (i, 0)),
        ),
        compiler_params=pltpu.CompilerParams(
            dimension_semantics=("parallel",),
        ),
    )(x2d, w1, b1, w2, b2, w3, b3, w4p, b4p)

    return out[:B, :OUT_DIM].astype(jnp.float32)


# Jit the whole forward so wrapper preprocessing / postprocessing fuses.
mlp_forward = jax.jit(_mlp_forward_impl)


def init_params(key):
    """Deterministic init matching nn.Linear shapes (f32, torch-default range).

    Weights stored as (in_features, out_features) = torch weight transposed.
    Biases stored as (1, out_features).
    """
    dims = [IN_DIM, 256, 128, 64, OUT_DIM]
    params = []
    keys = jax.random.split(key, len(dims) - 1)
    for k, fan_in, fan_out in zip(keys, dims[:-1], dims[1:]):
        kw, kb = jax.random.split(k)
        bound = 1.0 / jnp.sqrt(fan_in)
        w = jax.random.uniform(kw, (fan_in, fan_out), jnp.float32, -bound, bound)
        b = jax.random.uniform(kb, (1, fan_out), jnp.float32, -bound, bound)
        params.append((w, b))
    return params


def reference_forward(x_nchw, params):
    """Pure-JAX f32 reference for correctness check."""
    B = x_nchw.shape[0]
    h = x_nchw.reshape(B, IN_DIM)
    for i, (w, b) in enumerate(params):
        h = h @ w + b
        if i < 3:
            h = jnp.maximum(h, 0.0)
    return jax.nn.softmax(h, axis=-1)


if __name__ == "__main__":
    key = jax.random.PRNGKey(0)
    kx, kp = jax.random.split(key)

    B = 8
    x = jax.random.normal(kx, (B, 1, 28, 28), jnp.float32)
    params = init_params(kp)
    kernel_params = prepare_params(params)   # bf16 cast + fc4 padding done once

    out = mlp_forward(x, kernel_params)
    out = jax.block_until_ready(out)

    ref = reference_forward(x, params)
    assert out.shape == (B, 10)
    # bf16 matmuls, bf16 input/output streams, approx reciprocal -> loosened
    # tolerance vs the f32 reference.
    assert jnp.allclose(out, ref, atol=2e-2, rtol=2e-2), "mismatch vs reference"
    assert jnp.allclose(jnp.sum(out, axis=-1), 1.0, atol=1e-2), "softmax rows must sum to 1"

    print("KERNEL_OK")
</pallas_src>

<mosaic_0001>
module attributes {stable_mosaic.version = 11 : i64} {
  func.func @mlp_kernel(%arg0: i32, %arg1: memref<8x784xbf16, #tpu.memory_space<vmem>>, %arg2: memref<784x256xbf16, #tpu.memory_space<vmem>>, %arg3: memref<1x256xf32, #tpu.memory_space<vmem>>, %arg4: memref<256x128xbf16, #tpu.memory_space<vmem>>, %arg5: memref<1x128xf32, #tpu.memory_space<vmem>>, %arg6: memref<128x64xbf16, #tpu.memory_space<vmem>>, %arg7: memref<1x64xf32, #tpu.memory_space<vmem>>, %arg8: memref<64x128xbf16, #tpu.memory_space<vmem>>, %arg9: memref<1x128xf32, #tpu.memory_space<vmem>>, %arg10: memref<8x128xbf16, #tpu.memory_space<vmem>>) attributes {dimension_semantics = [#tpu.dimension_semantics<parallel>], iteration_bounds = array<i64: 1>, scalar_prefetch = 0 : i64, scratch_operands = 0 : i64, tpu.core_type = #tpu.core_type<tc>, window_params = [{transform_indices = @transform_0, window_bounds = array<i64: 8, 784>}, {pipeline_mode = #tpu.pipeline_mode<synchronous>, transform_indices = @transform_1, window_bounds = array<i64: 784, 256>}, {pipeline_mode = #tpu.pipeline_mode<synchronous>, transform_indices = @transform_2, window_bounds = array<i64: 1, 256>}, {pipeline_mode = #tpu.pipeline_mode<synchronous>, transform_indices = @transform_3, window_bounds = array<i64: 256, 128>}, {pipeline_mode = #tpu.pipeline_mode<synchronous>, transform_indices = @transform_4, window_bounds = array<i64: 1, 128>}, {pipeline_mode = #tpu.pipeline_mode<synchronous>, transform_indices = @transform_5, window_bounds = array<i64: 128, 64>}, {pipeline_mode = #tpu.pipeline_mode<synchronous>, transform_indices = @transform_6, window_bounds = array<i64: 1, 64>}, {pipeline_mode = #tpu.pipeline_mode<synchronous>, transform_indices = @transform_7, window_bounds = array<i64: 64, 128>}, {pipeline_mode = #tpu.pipeline_mode<synchronous>, transform_indices = @transform_8, window_bounds = array<i64: 1, 128>}, {transform_indices = @transform_9, window_bounds = array<i64: 8, 128>}]} {
    %c0 = arith.constant 0 : index
    %c0_0 = arith.constant 0 : index
    %0 = vector.load %arg1[%c0, %c0_0] : memref<8x784xbf16, #tpu.memory_space<vmem>>, vector<8x784xbf16>
    %c0_1 = arith.constant 0 : index
    %c0_2 = arith.constant 0 : index
    %1 = vector.load %arg2[%c0_1, %c0_2] : memref<784x256xbf16, #tpu.memory_space<vmem>>, vector<784x256xbf16>
    %cst = arith.constant dense<0.000000e+00> : vector<8x256xf32>
    %2 = tpu.matmul %0, %1, %cst {dimension_numbers = #tpu.dot_dimension_numbers<[1], [0], [0], [1], [0, 0, 1, 1], [], []>} : vector<8x784xbf16>, vector<784x256xbf16>, vector<8x256xf32> -> vector<8x256xf32>
    %c0_3 = arith.constant 0 : index
    %c0_4 = arith.constant 0 : index
    %3 = vector.load %arg3[%c0_3, %c0_4] : memref<1x256xf32, #tpu.memory_space<vmem>>, vector<1x256xf32>
    %4 = vector.broadcast %3 : vector<1x256xf32> to vector<8x256xf32>
    %5 = arith.addf %2, %4 : vector<8x256xf32>
    %cst_5 = arith.constant 0.000000e+00 : f32
    %6 = vector.broadcast %cst_5 : f32 to vector<8x256xf32>
    %7 = arith.maximumf %5, %6 : vector<8x256xf32>
    %8 = arith.truncf %7 : vector<8x256xf32> to vector<8x256xbf16>
    %c0_6 = arith.constant 0 : index
    %c0_7 = arith.constant 0 : index
    %9 = vector.load %arg4[%c0_6, %c0_7] : memref<256x128xbf16, #tpu.memory_space<vmem>>, vector<256x128xbf16>
    %cst_8 = arith.constant dense<0.000000e+00> : vector<8x128xf32>
    %10 = tpu.matmul %8, %9, %cst_8 {dimension_numbers = #tpu.dot_dimension_numbers<[1], [0], [0], [1], [0, 0, 1, 1], [], []>} : vector<8x256xbf16>, vector<256x128xbf16>, vector<8x128xf32> -> vector<8x128xf32>
    %c0_9 = arith.constant 0 : index
    %c0_10 = arith.constant 0 : index
    %11 = vector.load %arg5[%c0_9, %c0_10] : memref<1x128xf32, #tpu.memory_space<vmem>>, vector<1x128xf32>
    %12 = vector.broadcast %11 : vector<1x128xf32> to vector<8x128xf32>
    %13 = arith.addf %10, %12 : vector<8x128xf32>
    %cst_11 = arith.constant 0.000000e+00 : f32
    %14 = vector.broadcast %cst_11 : f32 to vector<8x128xf32>
    %15 = arith.maximumf %13, %14 : vector<8x128xf32>
    %16 = arith.truncf %15 : vector<8x128xf32> to vector<8x128xbf16>
    %c0_12 = arith.constant 0 : index
    %c0_13 = arith.constant 0 : index
    %17 = vector.load %arg6[%c0_12, %c0_13] : memref<128x64xbf16, #tpu.memory_space<vmem>>, vector<128x64xbf16>
    %cst_14 = arith.constant dense<0.000000e+00> : vector<8x64xf32>
    %18 = tpu.matmul %16, %17, %cst_14 {dimension_numbers = #tpu.dot_dimension_numbers<[1], [0], [0], [1], [0, 0, 1, 1], [], []>} : vector<8x128xbf16>, vector<128x64xbf16>, vector<8x64xf32> -> vector<8x64xf32>
    %c0_15 = arith.constant 0 : index
    %c0_16 = arith.constant 0 : index
    %19 = vector.load %arg7[%c0_15, %c0_16] : memref<1x64xf32, #tpu.memory_space<vmem>>, vector<1x64xf32>
    %20 = vector.broadcast %19 : vector<1x64xf32> to vector<8x64xf32>
    %21 = arith.addf %18, %20 : vector<8x64xf32>
    %cst_17 = arith.constant 0.000000e+00 : f32
    %22 = vector.broadcast %cst_17 : f32 to vector<8x64xf32>
    %23 = arith.maximumf %21, %22 : vector<8x64xf32>
    %24 = arith.truncf %23 : vector<8x64xf32> to vector<8x64xbf16>
    %c0_18 = arith.constant 0 : index
    %c0_19 = arith.constant 0 : index
    %25 = vector.load %arg8[%c0_18, %c0_19] : memref<64x128xbf16, #tpu.memory_space<vmem>>, vector<64x128xbf16>
    %cst_20 = arith.constant dense<0.000000e+00> : vector<8x128xf32>
    %26 = tpu.matmul %24, %25, %cst_20 {dimension_numbers = #tpu.dot_dimension_numbers<[1], [0], [0], [1], [0, 0, 1, 1], [], []>} : vector<8x64xbf16>, vector<64x128xbf16>, vector<8x128xf32> -> vector<8x128xf32>
    %c0_21 = arith.constant 0 : index
    %c0_22 = arith.constant 0 : index
    %27 = vector.load %arg9[%c0_21, %c0_22] : memref<1x128xf32, #tpu.memory_space<vmem>>, vector<1x128xf32>
    %28 = vector.broadcast %27 : vector<1x128xf32> to vector<8x128xf32>
    %29 = arith.addf %26, %28 : vector<8x128xf32>
    %cst_23 = arith.constant dense<0xFF800000> : vector<8xf32>
    %30 = vector.multi_reduction <maximumf>, %29, %cst_23 [1] : vector<8x128xf32> to vector<8xf32>
    %31 = vector.shape_cast %30 : vector<8xf32> to vector<8x1xf32>
    %32 = vector.broadcast %31 : vector<8x1xf32> to vector<8x128xf32>
    %33 = arith.subf %29, %32 : vector<8x128xf32>
    %34 = math.exp %33 : vector<8x128xf32>
    %cst_24 = arith.constant dense<0.000000e+00> : vector<8xf32>
    %35 = vector.multi_reduction <add>, %34, %cst_24 [1] : vector<8x128xf32> to vector<8xf32>
    %36 = vector.shape_cast %35 : vector<8xf32> to vector<8x1xf32>
    %37 = tpu.reciprocal %36 {approx = true} : vector<8x1xf32> -> vector<8x1xf32>
    %38 = vector.broadcast %37 : vector<8x1xf32> to vector<8x128xf32>
    %39 = arith.mulf %34, %38 : vector<8x128xf32>
    %40 = arith.truncf %39 : vector<8x128xf32> to vector<8x128xbf16>
    %c0_25 = arith.constant 0 : index
    %c0_26 = arith.constant 0 : index
    %41 = vector.load %arg10[%c0_25, %c0_26] : memref<8x128xbf16, #tpu.memory_space<vmem>>, vector<8x128xbf16>
    tpu.vector_store %arg10[%c0_25, %c0_26], %40 {strides = array<i32>} : memref<8x128xbf16, #tpu.memory_space<vmem>>, vector<8x128xbf16>,
    return
  }
  func.func @transform_0(%arg0: i32) -> (i32, i32) {
    %c0_i32 = arith.constant 0 : i32
    %c0_i32_0 = arith.constant 0 : i32
    return %arg0, %c0_i32 : i32, i32
  }
  func.func @transform_1(%arg0: i32) -> (i32, i32) {
    %c0_i32 = arith.constant 0 : i32
    %c0_i32_0 = arith.constant 0 : i32
    %c0_i32_1 = arith.constant 0 : i32
    return %c0_i32, %c0_i32_0 : i32, i32
  }
  func.func @transform_2(%arg0: i32) -> (i32, i32) {
    %c0_i32 = arith.constant 0 : i32
    %c0_i32_0 = arith.constant 0 : i32
    %c0_i32_1 = arith.constant 0 : i32
    return %c0_i32, %c0_i32_0 : i32, i32
  }
  func.func @transform_3(%arg0: i32) -> (i32, i32) {
    %c0_i32 = arith.constant 0 : i32
    %c0_i32_0 = arith.constant 0 : i32
    %c0_i32_1 = arith.constant 0 : i32
    return %c0_i32, %c0_i32_0 : i32, i32
  }
  func.func @transform_4(%arg0: i32) -> (i32, i32) {
    %c0_i32 = arith.constant 0 : i32
    %c0_i32_0 = arith.constant 0 : i32
    %c0_i32_1 = arith.constant 0 : i32
    return %c0_i32, %c0_i32_0 : i32, i32
  }
  func.func @transform_5(%arg0: i32) -> (i32, i32) {
    %c0_i32 = arith.constant 0 : i32
    %c0_i32_0 = arith.constant 0 : i32
    %c0_i32_1 = arith.constant 0 : i32
    return %c0_i32, %c0_i32_0 : i32, i32
  }
  func.func @transform_6(%arg0: i32) -> (i32, i32) {
    %c0_i32 = arith.constant 0 : i32
    %c0_i32_0 = arith.constant 0 : i32
    %c0_i32_1 = arith.constant 0 : i32
    return %c0_i32, %c0_i32_0 : i32, i32
  }
  func.func @transform_7(%arg0: i32) -> (i32, i32) {
    %c0_i32 = arith.constant 0 : i32
    %c0_i32_0 = arith.constant 0 : i32
    %c0_i32_1 = arith.constant 0 : i32
    return %c0_i32, %c0_i32_0 : i32, i32
  }
  func.func @transform_8(%arg0: i32) -> (i32, i32) {
    %c0_i32 = arith.constant 0 : i32
    %c0_i32_0 = arith.constant 0 : i32
    %c0_i32_1 = arith.constant 0 : i32
    return %c0_i32, %c0_i32_0 : i32, i32
  }
  func.func @transform_9(%arg0: i32) -> (i32, i32) {
    %c0_i32 = arith.constant 0 : i32
    %c0_i32_0 = arith.constant 0 : i32
    return %arg0, %c0_i32 : i32, i32
  }
}

</mosaic_0001>

<bundles_post_ra>
// kernel: _mlp_forward_impl.1
= control target key start
LH: loop header
LB: loop body
LE: loop exit
PB: predicated region body
PF: predicated region fallthrough
CT: control target
= control target key end

     0   :  { %14 = vsyncpa [#allocation3], 0  ;;  %s1656_s30 = smov [#allocation2]   ;;  %s1847_s0 = inlined_call_operand.vmem [shape: bf16[8,784], index: 0, kind: input, shape index: {}]   ;;  %s1848_s1 = inlined_call_operand.hbm [shape: bf16[784,256], index: 1, kind: input, shape index: {}]   ;;  %s1849_s2 = inlined_call_operand.vmem [shape: f32[1,256], index: 2, kind: input, shape index: {}]   ;;  %s1850_s3 = inlined_call_operand.vmem [shape: bf16[256,128], index: 3, kind: input, shape index: {}]   ;;  %s1851_s4 = inlined_call_operand.vmem [shape: f32[1,128], index: 4, kind: input, shape index: {}]   ;;  %s1852_s5 = inlined_call_operand.vmem [shape: bf16[128,64], index: 5, kind: input, shape index: {}]   ;;  %s1853_s6 = inlined_call_operand.vmem [shape: f32[1,64], index: 6, kind: input, shape index: {}]   ;;  %s1854_s7 = inlined_call_operand.vmem [shape: bf16[64,128], index: 7, kind: input, shape index: {}]   ;;  %s1855_s8 = inlined_call_operand.vmem [shape: f32[1,128], index: 8, kind: input, shape index: {}]   ;;  %s1856_s9 = inlined_call_operand.vmem [shape: bf16[8,128], index: 9, kind: output, shape index: {}]  }
   0x1   :  { %s22_s10 = sshll.u32 %s1656_s30, 4  ;;  %s23_s10 = int_to_ptr.vmem [resolvable:$true] %s22_s10 }
   0x2   :  { %s1642_s11 = scalar_lea.vmem %s23_s10, 12544  ;;  %p1647_p1 = scmp.lt.s32.totalorder %s23_s10, %s23_s10 }
   0x3   :  { %p1643_p0 = scmp.ne.s32.totalorder %s23_s10, %s1642_s11  ;;  %p1648_p2 = scmp.lt.s32.totalorder %s1642_s11, %s1642_s11 }
   0x5   :  { %p1649_p3 = por %p1648_p2, %p1647_p1 }
   0x7   :  { %p1650_p4 = pnand %p1649_p3, %p1643_p0 }
   0x9   :  { %1653 = shalt.err (!%p1650_p4)
}
   0xa   :  { %s1657_s12 = smov 128   ;;  %s1658_s13 = smov 8  }
   0xb   :  { %28 = dma.hbm_to_vmem [thread:$0]  %s1848_s1, 12544, %s23_s10, [#allocation3], %s1657_s12, %s1657_s12, %s1658_s13  }
   0xc   :  { %1654 = dma.done.wait [#allocation3], 12544  }
   0xd   :  { %1655 = vsyncadd [#allocation3], 4294954752  ;;  %v1448_v0 = vld [vmem:[#allocation2 + $0x74] ss:$8 sps:$4 sm:$0xff]   ;;  %v1450_v1 = vld [vmem:[#allocation2 + $0x70] ss:$8 sps:$4 sm:$0xff]  }
   0xe   :  { %679 = vmatprep.subr.bf16.mxu0 %v1448_v0  ;;  %v1451_v2 = vld [vmem:[#allocation2 + $0x174] ss:$8 sps:$4 sm:$0xff]   ;;  %v1453_v3 = vld [vmem:[#allocation2 + $0x170] ss:$8 sps:$4 sm:$0xff]   ;;  %v1454_v4 = vld [vmem:[#allocation2 + $0x64] ss:$8 sps:$4 sm:$0xff]  }
   0xf   :  { %680 = vmatpush1.bf16.msra.mxu0 %v1450_v1  ;;  %v1456_v5 = vld [vmem:[#allocation2 + $0x60] ss:$8 sps:$4 sm:$0xff]   ;;  %720 = vmatprep.subr.bf16.mxu1 %v1451_v2  ;;  %v1457_v6 = vld [vmem:[#allocation2 + $0x164] ss:$8 sps:$4 sm:$0xff]   ;;  %v1460_v8 = vld [vmem:[#allocation2 + $0x54] ss:$8 sps:$4 sm:$0xff]  }
  0x10   :  { %721 = vmatpush1.bf16.msra.mxu1 %v1453_v3  ;;  %681 = vmatprep.subr.bf16.mxu0 %v1454_v4  ;;  %v1459_v7 = vld [vmem:[#allocation2 + $0x160] ss:$8 sps:$4 sm:$0xff]   ;;  %v1462_v9 = vld [vmem:[#allocation2 + $0x50] ss:$8 sps:$4 sm:$0xff]   ;;  %v1463_v10 = vld [vmem:[#allocation2 + $0x154] ss:$8 sps:$4 sm:$0xff]  }
  0x11   :  { %722 = vmatprep.subr.bf16.mxu1 %v1457_v6  ;;  %v1466_v11 = vld [vmem:[#allocation2 + $0x44] ss:$8 sps:$4 sm:$0xff]   ;;  %v1465_v12 = vld [vmem:[#allocation2 + $0x150] ss:$8 sps:$4 sm:$0xff]   ;;  %v1468_v14 = vld [vmem:[#allocation2 + $0x40] ss:$8 sps:$4 sm:$0xff]  }
  0x12   :  { %v1469_v13 = vld [vmem:[#allocation2 + $0x144] ss:$8 sps:$4 sm:$0xff]   ;;  %v1472_v15 = vld [vmem:[#allocation2 + $0x34] ss:$8 sps:$4 sm:$0xff]   ;;  %v1471_v16 = vld [vmem:[#allocation2 + $0x140] ss:$8 sps:$4 sm:$0xff]  }
  0x13   :  { %682 = vmatpush1.bf16.msra.mxu0 %v1456_v5  ;;  %v1475_v17 = vld [vmem:[#allocation2 + $0x134] ss:$8 sps:$4 sm:$0xff]   ;;  %v1474_v18 = vld [vmem:[#allocation2 + $0x30] ss:$8 sps:$4 sm:$0xff]   ;;  %v1478_v19 = vld [vmem:[#allocation2 + $0x24] ss:$8 sps:$4 sm:$0xff]  }
  0x14   :  { %683 = vmatprep.subr.bf16.mxu0 %v1460_v8  ;;  %723 = vmatpush1.bf16.msra.mxu1 %v1459_v7  ;;  %v1477_v20 = vld [vmem:[#allocation2 + $0x130] ss:$8 sps:$4 sm:$0xff]   ;;  %v1481_v21 = vld [vmem:[#allocation2 + $0x124] ss:$8 sps:$4 sm:$0xff]   ;;  %v1480_v22 = vld [vmem:[#allocation2 + $0x20] ss:$8 sps:$4 sm:$0xff]  }
  0x15   :  { %724 = vmatprep.subr.bf16.mxu1 %v1463_v10  ;;  %v1484_v23 = vld [vmem:[#allocation2 + $0x14] ss:$8 sps:$4 sm:$0xff]   ;;  %v1483_v24 = vld [vmem:[#allocation2 + $0x120] ss:$8 sps:$4 sm:$0xff]   ;;  %v1486_v26 = vld [vmem:[#allocation2 + $0x10] ss:$8 sps:$4 sm:$0xff]  }
  0x16   :  { %v1487_v25 = vld [vmem:[#allocation2 + $0x114] ss:$8 sps:$4 sm:$0xff]   ;;  %v1490_v27 = vld [vmem:[#allocation2 + $0x4] ss:$8 sps:$4 sm:$0xff]   ;;  %v1489_v28 = vld [vmem:[#allocation2 + $0x110] ss:$8 sps:$4 sm:$0xff]  }
  0x17   :  { %684 = vmatpush1.bf16.msra.mxu0 %v1462_v9  ;;  %v1493_v29 = vld [vmem:[#allocation2 + $0x104] ss:$8 sps:$4 sm:$0xff]   ;;  %v1492_v30 = vld [vmem:[#allocation2] ss:$8 sps:$4 sm:$0xff]   ;;  %v1496_v31 = vld [vmem:[#allocation2 + $0xf4] ss:$8 sps:$4 sm:$0xff]  }
  0x18   :  { %685 = vmatprep.subr.bf16.mxu0 %v1466_v11  ;;  %725 = vmatpush1.bf16.msra.mxu1 %v1465_v12  ;;  %v1495_v32 = vld [vmem:[#allocation2 + $0x100] ss:$8 sps:$4 sm:$0xff]   ;;  %v1499_v33 = vld [vmem:[#allocation2 + $0x1f4] ss:$8 sps:$4 sm:$0xff]   ;;  %v1498_v34 = vld [vmem:[#allocation2 + $0xf0] ss:$8 sps:$4 sm:$0xff]  }
  0x19   :  { %726 = vmatprep.subr.bf16.mxu1 %v1469_v13  ;;  %v1502_v35 = vld [vmem:[#allocation2 + $0xe4] ss:$8 sps:$4 sm:$0xff]   ;;  %v1501_v36 = vld [vmem:[#allocation2 + $0x1f0] ss:$8 sps:$4 sm:$0xff]   ;;  %v1504_v38 = vld [vmem:[#allocation2 + $0xe0] ss:$8 sps:$4 sm:$0xff]  }
  0x1a   :  { %v1505_v37 = vld [vmem:[#allocation2 + $0x1e4] ss:$8 sps:$4 sm:$0xff]   ;;  %v1508_v39 = vld [vmem:[#allocation2 + $0xd4] ss:$8 sps:$4 sm:$0xff]   ;;  %v1507_v40 = vld [vmem:[#allocation2 + $0x1e0] ss:$8 sps:$4 sm:$0xff]  }
  0x1b   :  { %686 = vmatpush1.bf16.msra.mxu0 %v1468_v14  ;;  %v1511_v41 = vld [vmem:[#allocation2 + $0x1d4] ss:$8 sps:$4 sm:$0xff]   ;;  %v1510_v42 = vld [vmem:[#allocation2 + $0xd0] ss:$8 sps:$4 sm:$0xff]   ;;  %v1514_v43 = vld [vmem:[#allocation2 + $0xc4] ss:$8 sps:$4 sm:$0xff]  }
  0x1c   :  { %687 = vmatprep.subr.bf16.mxu0 %v1472_v15  ;;  %727 = vmatpush1.bf16.msra.mxu1 %v1471_v16  ;;  %v1513_v44 = vld [vmem:[#allocation2 + $0x1d0] ss:$8 sps:$4 sm:$0xff]   ;;  %v1517_v45 = vld [vmem:[#allocation2 + $0x1c4] ss:$8 sps:$4 sm:$0xff]   ;;  %v1516_v47 = vld [vmem:[#allocation2 + $0xc0] ss:$8 sps:$4 sm:$0xff]  }
  0x1d   :  { %728 = vmatprep.subr.bf16.mxu1 %v1475_v17  ;;  %v47_v46 = vld [vmem:[%s1847_s0] sm:$0xff]  ;;  %v1520_v49 = vld [vmem:[#allocation2 + $0xb4] ss:$8 sps:$4 sm:$0xff]   ;;  %v48_v50 = vld [vmem:[%s1847_s0 + $0x8] sm:$0xff]  ;;  %vm675_vm0 = vcmask 130048   ;;  %v1659_v16 = vmov 0  }
  0x1e   :  { %v1237_v48 = vcombine.high %v47_v46, %v47_v46  ;;  %v1519_v51 = vld [vmem:[#allocation2 + $0x1c0] ss:$8 sps:$4 sm:$0xff]   ;;  %v1239_v52 = vcombine.high %v48_v50, %v48_v50  ;;  %v1523_v53 = vld [vmem:[#allocation2 + $0x1b4] ss:$8 sps:$4 sm:$0xff]   ;;  %v1522_v54 = vld [vmem:[#allocation2 + $0xb0] ss:$8 sps:$4 sm:$0xff]   ;;  %v1236_v5 = vcombine.low %v47_v46, %v47_v46  ;;  %v1238_v7 = vcombine.low %v48_v50, %v48_v50 }
  0x1f   :  { %688 = vmatpush1.bf16.msra.mxu0 %v1474_v18  ;;  %v1526_v55 = vld [vmem:[#allocation2 + $0xa4] ss:$8 sps:$4 sm:$0xff]   ;;  %v1525_v56 = vld [vmem:[#allocation2 + $0x1b0] ss:$8 sps:$4 sm:$0xff]   ;;  %v1528_v58 = vld [vmem:[#allocation2 + $0xa0] ss:$8 sps:$4 sm:$0xff]  }
  0x20   :  { %689 = vmatprep.subr.bf16.mxu0 %v1478_v19  ;;  %729 = vmatpush1.bf16.msra.mxu1 %v1477_v20  ;;  %v1529_v57 = vld [vmem:[#allocation2 + $0x1a4] ss:$8 sps:$4 sm:$0xff]   ;;  %v1532_v59 = vld [vmem:[#allocation2 + $0x94] ss:$8 sps:$4 sm:$0xff]   ;;  %v1531_v60 = vld [vmem:[#allocation2 + $0x1a0] ss:$8 sps:$4 sm:$0xff]  }
  0x21   :  { %730 = vmatprep.subr.bf16.mxu1 %v1481_v21  ;;  %711 = vmatprep.mubr.bf16.mxu0 %v1237_v48  ;;  %v1535_v61 = vld [vmem:[#allocation2 + $0x194] ss:$8 sps:$4 sm:$0xff]   ;;  %v1534_v62 = vld [vmem:[#allocation2 + $0x90] ss:$8 sps:$4 sm:$0xff]   ;;  %v1538_v63 = vld [vmem:[#allocation2 + $0x84] ss:$8 sps:$4 sm:$0xff]  }
  0x22   :  { %752 = vmatprep.mubr.bf16.mxu1 %v1239_v52  ;;  %v1537_v0 = vld [vmem:[#allocation2 + $0x190] ss:$8 sps:$4 sm:$0xff]   ;;  %v1541_v1 = vld [vmem:[#allocation2 + $0x184] ss:$8 sps:$4 sm:$0xff]   ;;  %v1540_v2 = vld [vmem:[#allocation2 + $0x80] ss:$8 sps:$4 sm:$0xff]  }
  0x23   :  { %690 = vmatpush1.bf16.msra.mxu0 %v1480_v22  ;;  %v1548_v3 = vld [vmem:[#allocation2 + $0x274] ss:$8 sps:$4 sm:$0xff]   ;;  %v1545_v4 = vld [vmem:[#allocation2 + $0x180] ss:$8 sps:$4 sm:$0xff]   ;;  %v1546_v6 = vld [vmem:[#allocation2 + $0x270] ss:$8 sps:$4 sm:$0xff]  }
  0x24   :  { %691 = vmatprep.subr.bf16.mxu0 %v1484_v23  ;;  %731 = vmatpush1.bf16.msra.mxu1 %v1483_v24  ;;  %v1553_v8 = vld [vmem:[#allocation2 + $0x264] ss:$8 sps:$4 sm:$0xff]   ;;  %v1593_v10 = vld [vmem:[#allocation2 + $0x300] ss:$8 sps:$4 sm:$0xff]   ;;  %v1724_v12 = vld [vmem:[%s1847_s0 + $0x10] sm:$0xff]  ;;  %vm1661_vm1 = vmmov 0  }
  0x25   :  { %732 = vmatprep.subr.bf16.mxu1 %v1487_v25  ;;  %v1595_v9 = vld [vmem:[#allocation2 + $0x304] ss:$8 sps:$4 sm:$0xff]   ;;  %v1551_v11 = vld [vmem:[#allocation2 + $0x260] ss:$8 sps:$4 sm:$0xff]   ;;  %v1556_v13 = vld [vmem:[#allocation2 + $0x254] ss:$8 sps:$4 sm:$0xff]   ;;  %v1241_v14 = vcombine.high %v1724_v12, %v1724_v12 }
  0x26   :  { %v1554_v15 = vld [vmem:[#allocation2 + $0x250] ss:$8 sps:$4 sm:$0xff]   ;;  %v1559_v17 = vld [vmem:[#allocation2 + $0x244] ss:$8 sps:$4 sm:$0xff]   ;;  %v1557_v19 = vld [vmem:[#allocation2 + $0x240] ss:$8 sps:$4 sm:$0xff]  }
  0x27   :  { %692 = vmatpush1.bf16.msra.mxu0 %v1486_v26  ;;  %v1599_v18 = vld [vmem:[%s1847_s0 + $0x18] ss:$0 sps:$4 sm:$0xff]   ;;  %v1562_v20 = vld [vmem:[#allocation2 + $0x234] ss:$8 sps:$4 sm:$0xff]   ;;  %v1565_v22 = vld [vmem:[#allocation2 + $0x224] ss:$8 sps:$4 sm:$0xff]  }
  0x28   :  { %693 = vmatprep.subr.bf16.mxu0 %v1490_v27  ;;  %733 = vmatpush1.bf16.msra.mxu1 %v1489_v28  ;;  %v1560_v21 = vld [vmem:[#allocation2 + $0x230] ss:$8 sps:$4 sm:$0xff]   ;;  %v1563_v23 = vld [vmem:[#allocation2 + $0x220] ss:$8 sps:$4 sm:$0xff]   ;;  %v1568_v24 = vld [vmem:[#allocation2 + $0x214] ss:$8 sps:$4 sm:$0xff]  }
  0x29   :  { %734 = vmatprep.subr.bf16.mxu1 %v1493_v29  ;;  %v1566_v25 = vld [vmem:[#allocation2 + $0x210] ss:$8 sps:$4 sm:$0xff]   ;;  %v1571_v26 = vld [vmem:[#allocation2 + $0x204] ss:$8 sps:$4 sm:$0xff]   ;;  %v1569_v27 = vld [vmem:[#allocation2 + $0x200] ss:$8 sps:$4 sm:$0xff]  }
  0x2a   :  { %v1574_v28 = vld [vmem:[#allocation2 + $0x2f4] ss:$8 sps:$4 sm:$0xff]   ;;  %v1572_v29 = vld [vmem:[#allocation2 + $0x2f0] ss:$8 sps:$4 sm:$0xff]   ;;  %v1607_v50 = vld [vmem:[%s1850_s3 + $0x28] sm:$0xff]   ;;  %vm1176_vm2 = vcmask 523264  }
  0x2b   :  { %694 = vmatpush1.bf16.msra.mxu0 %v1492_v30  ;;  %v1577_v30 = vld [vmem:[#allocation2 + $0x2e4] ss:$8 sps:$4 sm:$0xff]   ;;  %v1603_v46 = vld [vmem:[%s1850_s3 + $0x38] sm:$0xff]   ;;  %v1605_v48 = vld [vmem:[%s1850_s3 + $0x30] sm:$0xff]  }
  0x2c   :  { %695 = vmatprep.subr.bf16.mxu0 %v1496_v31  ;;  %735 = vmatpush1.bf16.msra.mxu1 %v1495_v32  ;;  %v1575_v31 = vld [vmem:[#allocation2 + $0x2e0] ss:$8 sps:$4 sm:$0xff]   ;;  %v1580_v32 = vld [vmem:[#allocation2 + $0x2d4] ss:$8 sps:$4 sm:$0xff]  }
  0x2d   :  { %736 = vmatprep.subr.bf16.mxu1 %v1499_v33  ;;  %v1578_v33 = vld [vmem:[#allocation2 + $0x2d0] ss:$8 sps:$4 sm:$0xff]   ;;  %v1609_v52 = vld [vmem:[%s1850_s3 + $0x20] sm:$0xff]  }
  0x2f   :  { %696 = vmatpush2.bf16.msra.mxu0 %v1498_v34  ;;  %v1583_v34 = vld [vmem:[#allocation2 + $0x2c4] ss:$8 sps:$4 sm:$0xff]  }
  0x30   :  { %697 = vmatprep.subr.bf16.mxu0 %v1502_v35  ;;  %737 = vmatpush2.bf16.msra.mxu1 %v1501_v36  ;;  %v1581_v35 = vld [vmem:[#allocation2 + $0x2c0] ss:$8 sps:$4 sm:$0xff]   ;;  %v1586_v36 = vld [vmem:[#allocation2 + $0x2b4] ss:$8 sps:$4 sm:$0xff]  }
  0x31   :  { %738 = vmatprep.subr.bf16.mxu1 %v1505_v37  ;;  %v1584_v37 = vld [vmem:[#allocation2 + $0x2b0] ss:$8 sps:$4 sm:$0xff]  }
  0x33   :  { %698 = vmatpush2.bf16.msra.mxu0 %v1504_v38  ;;  %v1589_v38 = vld [vmem:[#allocation2 + $0x2a4] ss:$8 sps:$4 sm:$0xff]  }
  0x34   :  { %699 = vmatprep.subr.bf16.mxu0 %v1508_v39  ;;  %739 = vmatpush2.bf16.msra.mxu1 %v1507_v40  ;;  %v1587_v39 = vld [vmem:[#allocation2 + $0x2a0] ss:$8 sps:$4 sm:$0xff]   ;;  %v1592_v40 = vld [vmem:[#allocation2 + $0x294] ss:$8 sps:$4 sm:$0xff]  }
  0x35   :  { %740 = vmatprep.subr.bf16.mxu1 %v1511_v41  ;;  %v1590_v41 = vld [vmem:[#allocation2 + $0x290] ss:$8 sps:$4 sm:$0xff]  }
  0x37   :  { %700 = vmatpush2.bf16.msra.mxu0 %v1510_v42  ;;  %v1598_v42 = vld [vmem:[#allocation2 + $0x284] ss:$8 sps:$4 sm:$0xff]  }
  0x38   :  { %701 = vmatprep.subr.bf16.mxu0 %v1514_v43  ;;  %741 = vmatpush2.bf16.msra.mxu1 %v1513_v44  ;;  %v1596_v43 = vld [vmem:[#allocation2 + $0x280] ss:$8 sps:$4 sm:$0xff]   ;;  %v1240_v44 = vcombine.low %v1724_v12, %v1724_v12 }
  0x39   :  { %742 = vmatprep.subr.bf16.mxu1 %v1517_v45  ;;  %v1602_v45 = vld [vmem:[%s1850_s3 + $0x78] sm:$0xff]  }
  0x3b   :  { %702 = vmatpush2.bf16.msra.mxu0 %v1516_v47  ;;  %v1604_v47 = vld [vmem:[%s1850_s3 + $0x70] sm:$0xff]  }
  0x3c   :  { %703 = vmatprep.subr.bf16.mxu0 %v1520_v49  ;;  %743 = vmatpush2.bf16.msra.mxu1 %v1519_v51  ;;  %v1606_v49 = vld [vmem:[%s1850_s3 + $0x68] sm:$0xff]   ;;  %v1608_v51 = vld [vmem:[%s1850_s3 + $0x60] sm:$0xff]  }
  0x3d   :  { %744 = vmatprep.subr.bf16.mxu1 %v1523_v53  ;;  %v1610_v53 = vld [vmem:[%s1850_s3 + $0x58] sm:$0xff]  }
  0x3f   :  { %704 = vmatpush2.bf16.msra.mxu0 %v1522_v54  ;;  %v1611_v54 = vld [vmem:[%s1850_s3 + $0x18] sm:$0xff]  }
  0x40   :  { %705 = vmatprep.subr.bf16.mxu0 %v1526_v55  ;;  %745 = vmatpush2.bf16.msra.mxu1 %v1525_v56  ;;  %v1612_v55 = vld [vmem:[%s1850_s3 + $0x50] sm:$0xff]  }
  0x41   :  { %746 = vmatprep.subr.bf16.mxu1 %v1529_v57  ;;  %v1613_v56 = vld [vmem:[%s1850_s3 + $0x10] sm:$0xff]   ;;  %v1614_v57 = vld [vmem:[%s1850_s3 + $0x48] sm:$0xff]  }
  0x43   :  { %706 = vmatpush2.bf16.msra.mxu0 %v1528_v58  ;;  %v1615_v58 = vld [vmem:[%s1850_s3 + $0x8] sm:$0xff]  }
  0x44   :  { %707 = vmatprep.subr.bf16.mxu0 %v1532_v59  ;;  %747 = vmatpush2.bf16.msra.mxu1 %v1531_v60  ;;  %v1616_v59 = vld [vmem:[%s1850_s3 + $0x40] sm:$0xff]  }
  0x45   :  { %748 = vmatprep.subr.bf16.mxu1 %v1535_v61  ;;  %v1617_v60 = vld [vmem:[%s1850_s3] sm:$0xff]   ;;  %v1660_v61 = vmov 0.0  }
  0x47   :  { %708 = vmatpush2.bf16.msra.mxu0 %v1534_v62 }
  0x48   :  { %709 = vmatprep.subr.bf16.mxu0 %v1538_v63  ;;  %749 = vmatpush2.bf16.msra.mxu1 %v1537_v0 }
  0x49   :  { %750 = vmatprep.subr.bf16.mxu1 %v1541_v1 }
  0x4b   :  { %710 = vmatpush2.bf16.msra.mxu0 %v1540_v2 }
  0x4c   :  { %761 = vmatprep.subr.bf16.mxu0 %v1548_v3  ;;  %751 = vmatpush2.bf16.msra.mxu1 %v1545_v4 }
  0x4d   :  { %816 = vmatprep.subr.bf16.mxu1 %v1595_v9 }
  0x4e   :  { %712 = vmatmul.mubr.bf16.vlgmr.msra.gmra.mxu0 %v1236_v5 }
  0x4f   :  { %762 = vmatpush1.bf16.msra.mxu0 %v1546_v6  ;;  %753 = vmatmul.mubr.bf16.vlgmr.msra.gmra.mxu1 %v1238_v7 }
  0x50   :  { %763 = vmatprep.subr.bf16.mxu0 %v1553_v8  ;;  %817 = vmatpush1.bf16.msra.mxu1 %v1593_v10  ;;  %v151_v10 = vlaneseq }
  0x51   :  { %834 = vmatprep.mubr.bf16.mxu1 %v1659_v16  ;;  %793 = vmatprep.mubr.bf16.mxu0 %v1241_v14 }
  0x52   :  { %1374 = vmatprep.subr.bf16.mxu1 %v1602_v45 }
  0x53   :  { %764 = vmatpush1.bf16.msra.mxu0 %v1551_v11  ;;  %v152_v11 = vshrl.u32 %v151_v10, 7 }
  0x54   :  { %765 = vmatprep.subr.bf16.mxu0 %v1556_v13  ;;  %v149_v13 = vld [vmem:[%s1849_s2] sm:$0x3] }
  0x55   :  { %v153_v12 = vsub.s32 0, %v152_v11  ;;  %v157_v14 = vsub.s32 1, %v152_v11 }
  0x57   :  { %766 = vmatpush1.bf16.msra.mxu0 %v1554_v15  ;;  %1341 = vmatmul.mubr.msk.bf16.vlgmr.msra.gmra.mxu1 %vm675_vm0, %v1599_v18  ;;  %v154_v15 = vrot.slane %v149_v13, %v153_v12  ;;  %v158_v16 = vrot.slane %v149_v13, %v157_v14 }
  0x58   :  { %767 = vmatprep.subr.bf16.mxu0 %v1559_v17  ;;  %1375 = vmatpush3.bf16.msra.mxu1 %v1603_v46 }
  0x59   :  { %1376 = vmatprep.subr.bf16.mxu1 %v1604_v47 }
  0x5b   :  { %768 = vmatpush1.bf16.msra.mxu0 %v1557_v19 }
  0x5c   :  { %769 = vmatprep.subr.bf16.mxu0 %v1562_v20  ;;  %1377 = vmatpush3.bf16.msra.mxu1 %v1605_v48 }
  0x5d   :  { %1378 = vmatprep.subr.bf16.mxu1 %v1606_v49 }
  0x5f   :  { %770 = vmatpush1.bf16.msra.mxu0 %v1560_v21 }
  0x60   :  { %771 = vmatprep.subr.bf16.mxu0 %v1565_v22  ;;  %1379 = vmatpush3.bf16.msra.mxu1 %v1607_v50 }
  0x61   :  { %1380 = vmatprep.subr.bf16.mxu1 %v1608_v51 }
  0x63   :  { %772 = vmatpush1.bf16.msra.mxu0 %v1563_v23 }
  0x64   :  { %773 = vmatprep.subr.bf16.mxu0 %v1568_v24  ;;  %1381 = vmatpush3.bf16.msra.mxu1 %v1609_v52  ;;  %v1628_v52 = vld [vmem:[%s1854_s7 + $0x8] sm:$0xff]  }
  0x65   :  { %1382 = vmatprep.subr.bf16.mxu1 %v1610_v53  ;;  %v1629_v53 = vld [vmem:[%s1854_s7] sm:$0xff]  }
  0x67   :  { %774 = vmatpush1.bf16.msra.mxu0 %v1566_v25 }
  0x68   :  { %775 = vmatprep.subr.bf16.mxu0 %v1571_v26  ;;  %1383 = vmatpush3.bf16.msra.mxu1 %v1611_v54  ;;  %v1359_v54 = vld [vmem:[%s1853_s6] ss:$0 sm:$0xff] }
  0x69   :  { %1384 = vmatprep.subr.bf16.mxu1 %v1612_v55 }
  0x6b   :  { %776 = vmatpush1.bf16.msra.mxu0 %v1569_v27 }
  0x6c   :  { %777 = vmatprep.subr.bf16.mxu0 %v1574_v28  ;;  %1385 = vmatpush3.bf16.msra.mxu1 %v1613_v56 }
  0x6d   :  { %1386 = vmatprep.subr.bf16.mxu1 %v1614_v57 }
  0x6f   :  { %778 = vmatpush2.bf16.msra.mxu0 %v1572_v29 }
  0x70   :  { %779 = vmatprep.subr.bf16.mxu0 %v1577_v30  ;;  %1387 = vmatpush3.bf16.msra.mxu1 %v1615_v58 }
  0x71   :  { %1388 = vmatprep.subr.bf16.mxu1 %v1616_v59 }
  0x73   :  { %780 = vmatpush2.bf16.msra.mxu0 %v1575_v31 }
  0x74   :  { %781 = vmatprep.subr.bf16.mxu0 %v1580_v32  ;;  %1389 = vmatpush3.bf16.msra.mxu1 %v1617_v60  ;;  %v1618_v32 = vld [vmem:[%s1852_s5 + $0x38] sm:$0xff]  }
  0x75   :  { %1410 = vmatprep.subr.bf16.mxu1 %v1660_v61 }
  0x77   :  { %782 = vmatpush2.bf16.msra.mxu0 %v1578_v33 }
  0x78   :  { %783 = vmatprep.subr.bf16.mxu0 %v1583_v34  ;;  %v1619_v34 = vld [vmem:[%s1852_s5 + $0x30] sm:$0xff]  }
  0x7b   :  { %784 = vmatpush2.bf16.msra.mxu0 %v1581_v35  ;;  %v1620_v35 = vld [vmem:[%s1852_s5 + $0x28] sm:$0xff]  }
  0x7c   :  { %785 = vmatprep.subr.bf16.mxu0 %v1586_v36  ;;  %v1621_v36 = vld [vmem:[%s1852_s5 + $0x20] sm:$0xff]  }
  0x7f   :  { %786 = vmatpush2.bf16.msra.mxu0 %v1584_v37  ;;  %v1622_v37 = vld [vmem:[%s1852_s5 + $0x18] sm:$0xff]  }
  0x80   :  { %787 = vmatprep.subr.bf16.mxu0 %v1589_v38  ;;  %v1623_v38 = vld [vmem:[%s1852_s5 + $0x10] sm:$0xff]  }
  0x83   :  { %788 = vmatpush2.bf16.msra.mxu0 %v1587_v39  ;;  %v1624_v39 = vld [vmem:[%s1852_s5 + $0x8] sm:$0xff]  }
  0x84   :  { %789 = vmatprep.subr.bf16.mxu0 %v1592_v40  ;;  %v1625_v40 = vld [vmem:[%s1852_s5] sm:$0xff]  }
  0x87   :  { %790 = vmatpush2.bf16.msra.mxu0 %v1590_v41  ;;  %v1626_v41 = vld [vmem:[%s1854_s7 + $0x18] sm:$0xff]  }
  0x88   :  { %791 = vmatprep.subr.bf16.mxu0 %v1598_v42  ;;  %v1627_v42 = vld [vmem:[%s1854_s7 + $0x10] sm:$0xff]  }
  0x8b   :  { %792 = vmatpush2.bf16.msra.mxu0 %v1596_v43 }
  0x8c   :  { %1430 = vmatprep.subr.bf16.mxu0 %v1660_v61 }
  0x8e   :  { %794 = vmatmul.mubr.bf16.vlgmr.msra.gmra.mxu0 %v1240_v44  ;;  %v1342_v44 = vld [vmem:[%s1851_s4] ss:$0 sm:$0xff] }
  0x8f   :  { %1438 = vmatprep.mubr.msk.bf16.mxu0 %vm1661_vm1, %v1660_v61  ;;  %1431 = vmatpush3.bf16.msra.mxu0 %v1626_v41 }
  0x90   :  { %1432 = vmatprep.subr.bf16.mxu0 %v1660_v61 }
  0x93   :  { %1433 = vmatpush3.bf16.msra.mxu0 %v1627_v42 }
  0x94   :  { %1434 = vmatprep.subr.bf16.mxu0 %v1660_v61 }
  0x97   :  { %1435 = vmatpush3.bf16.msra.mxu0 %v1628_v52 }
  0x98   :  { %1436 = vmatprep.subr.bf16.mxu0 %v1660_v61 }
  0x9b   :  { %1437 = vmatpush3.bf16.msra.mxu0 %v1629_v53 }
 0x10e   :  { %v713_v62 = vpop.f32.mrf.mxu0 }
 0x10f   :  { %v754_v0 = vpop.f32.mrf.mxu1  ;;  %v714_v17 = vadd.f32 %v713_v62, %v154_v15 }
 0x110   :  { %v715_v63 = vpop.f32.mrf.mxu0 }
 0x111   :  { %v756_v2 = vpop.f32.mrf.mxu1  ;;  %v716_v18 = vadd.f32 %v715_v63, %v158_v16  ;;  %v755_v19 = vadd.f32 %v754_v0, %v714_v17 }
 0x112   :  { %v717_v1 = vpop.f32.mrf.mxu0 }
 0x113   :  { %v758_v4 = vpop.f32.mrf.mxu1  ;;  %v757_v21 = vadd.f32 %v756_v2, %v716_v18 }
 0x114   :  { %v718_v3 = vpop.f32.mrf.mxu0 }
 0x115   :  { %v759_v5 = vpop.f32.mrf.mxu1 }
 0x117   :  { %v836_v6 = vpop.f32.mrf.mxu1 }
 0x119   :  { %v838_v7 = vpop.f32.mrf.mxu1 }
 0x11b   :  { %v840_v8 = vpop.f32.mrf.mxu1 }
 0x11d   :  { %v841_v9 = vpop.f32.mrf.mxu1 }
 0x14e   :  { %v795_v20 = vpop.f32.mrf.mxu0 }
 0x14f   :  { %v796_v22 = vadd.f32 %v795_v20, %v755_v19 }
 0x150   :  { %v797_v23 = vpop.f32.mrf.mxu0 }
 0x151   :  { %v837_v24 = vadd.f32 %v836_v6, %v796_v22  ;;  %v798_v25 = vadd.f32 %v797_v23, %v757_v21 }
 0x152   :  { %v799_v26 = vpop.f32.mrf.mxu0 }
 0x153   :  { %v839_v27 = vadd.f32 %v838_v7, %v798_v25  ;;  %v843_v28 = vmax.f32 %v837_v24, 0.0 }
 0x154   :  { %v800_v29 = vpop.f32.mrf.mxu0 }
 0x155   :  { %v844_v30 = vmax.f32 %v839_v27, 0.0  ;;  %v845_v33 = vpack.c.bf16 %v843_v28, %v843_v28 }
 0x157   :  { %v846_v31 = vpack.c.bf16 %v844_v30, %v844_v30 }
 0x159   :  { %1014 = vmatprep.mubr.bf16.mxu1 %v846_v31 }
 0x15a   :  { %1015 = vmatmul.mubr.bf16.vlgmr.msra.gmra.mxu1 %v845_v33 }
 0x15b   :  { %1411 = vmatpush3.bf16.msra.mxu1 %v1618_v32  ;;  %1426 = vmatprep.mubr.msk.bf16.mxu1 %vm1661_vm1, %v1660_v61 }
 0x15c   :  { %1412 = vmatprep.subr.bf16.mxu1 %v1660_v61 }
 0x15f   :  { %1413 = vmatpush3.bf16.msra.mxu1 %v1619_v34 }
 0x160   :  { %1414 = vmatprep.subr.bf16.mxu1 %v1660_v61 }
 0x163   :  { %1415 = vmatpush3.bf16.msra.mxu1 %v1620_v35 }
 0x164   :  { %1416 = vmatprep.subr.bf16.mxu1 %v1660_v61 }
 0x167   :  { %1417 = vmatpush3.bf16.msra.mxu1 %v1621_v36 }
 0x168   :  { %1418 = vmatprep.subr.bf16.mxu1 %v1660_v61 }
 0x16b   :  { %1419 = vmatpush3.bf16.msra.mxu1 %v1622_v37 }
 0x16c   :  { %1420 = vmatprep.subr.bf16.mxu1 %v1660_v61 }
 0x16f   :  { %1421 = vmatpush3.bf16.msra.mxu1 %v1623_v38 }
 0x170   :  { %1422 = vmatprep.subr.bf16.mxu1 %v1660_v61 }
 0x173   :  { %1423 = vmatpush3.bf16.msra.mxu1 %v1624_v39 }
 0x174   :  { %1424 = vmatprep.subr.bf16.mxu1 %v1660_v61  ;;  %v1368_v61 = vld [vmem:[%s1855_s8] ss:$0 sm:$0xff] }
 0x177   :  { %1425 = vmatpush3.bf16.msra.mxu1 %v1625_v40 }
 0x21a   :  { %v1390_v43 = vpop.f32.mrf.mxu1 }
 0x21c   :  { %v1391_v45 = vpop.f32.mrf.mxu1 }
 0x21d   :  { %v1392_v46 = vadd.f32 %v1391_v45, %v1390_v43 }
 0x21e   :  { %v1393_v47 = vpop.f32.mrf.mxu1 }
 0x21f   :  { %v1017_v48 = vadd.f32 %v1392_v46, %v1342_v44 }
 0x220   :  { %v1394_v49 = vpop.f32.mrf.mxu1 }
 0x221   :  { %v1022_v50 = vmax.f32 %v1017_v48, 0.0 }
 0x223   :  { %v1023_v51 = vpack.c.bf16 %v1022_v50, %v1022_v50 }
 0x225   :  { %1427 = vmatmul.mubr.bf16.vlgmr.msra.gmra.mxu1 %v1023_v51 }
 0x2e5   :  { %v1129_v55 = vpop.f32.mrf.mxu1 }
 0x2e6   :  { %v1130_v56 = vadd.f32 %v1359_v54, %v1129_v55 }
 0x2e7   :  { %v1428_v57 = vpop.f32.mrf.mxu1 }
 0x2e8   :  { %v1135_v58 = vmax.f32 %v1130_v56, 0.0 }
 0x2e9   :  { %v1132_v59 = vpop.f32.mrf.mxu1 }
 0x2ea   :  { %v1136_v60 = vpack.c.bf16 %v1135_v58, %v1135_v58 }
 0x2eb   :  { %v1429_v62 = vpop.f32.mrf.mxu1 }
 0x2ec   :  { %1439 = vmatmul.mubr.msk.bf16.vlgmr.msra.gmra.mxu0 %vm1176_vm2, %v1136_v60 }
 0x3ac   :  { %v1214_v63 = vpop.f32.mrf.mxu0 }
 0x3ad   :  { %v1215_v0 = vadd.f32 %v1368_v61, %v1214_v63 }
 0x3ae   :  { %v1440_v1 = vpop.f32.mrf.mxu0 }
 0x3af   :  { %1220 = vmax.xlane.f32.xlu0 %v1215_v0 }
 0x3b0   :  { %v1217_v2 = vpop.f32.mrf.mxu0 }
 0x3b2   :  { %v1441_v3 = vpop.f32.mrf.mxu0 }
 0x438   :  { %v1221_v4 = vpop.xlane.xlu0 %1220 }
 0x439   :  { %v1222_v5 = vsub.f32 %v1215_v0, %v1221_v4 }
 0x43b   :  { %v1223_v6 = vmul.f32 1.442695, %v1222_v5 }
 0x43d   :  { %1630 = vpow2.f32 %v1223_v6 }
 0x44a   :  { %v1631_v7 = vpop.eup %1630 }
 0x44b   :  { %1225 = vadd.xlane.f32.xlu0 %v1631_v7 }
 0x4d4   :  { %v1226_v8 = vpop.xlane.xlu0 %1225 }
 0x4d5   :  { %1632 = vrcp.f32 %v1226_v8 }
 0x4e2   :  { %v1633_v9 = vpop.eup %1632 }
 0x4e3   :  { %v1228_v10 = vmul.f32 %v1633_v9, %v1631_v7 }
 0x4e5   :  { %v1229_v11 = vpack.c.bf16 %v1228_v10, %v1228_v10 }
 0x4e7   :  { %1230 = vst [vmem:[%s1856_s9] sm:$0xf] %v1229_v11 }
 0x4e8   :  { %1235 = vsyncpa [#allocation3], 1 }

</bundles_post_ra>
